<compile_context>
chip_gen: v6e
topology: v6e:2x2x1
jax: 0.10.0
libtpu: 0.0.40
codegen_flags: <defaults>
</compile_context>

<pallas_src>
import functools

import jax
import jax.numpy as jnp
from jax.experimental import pallas as pl
from jax.experimental.pallas import tpu as pltpu


def _slot_block_kernel(x_ref, w1_ref, w2_ref, o_ref, *, groups, ksize, pad):
    """One batch-block per grid step, NCL (channels, length) slabs.

    x_ref : (bb, Cb, L)        f32 input
    w1_ref: (Ct, Cb)           bf16 1x1-conv weight (torch layout, ready for left-matmul)
    w2_ref: (G, K*bpg, tpg)    bf16 grouped-conv weight, taps stacked along M
    o_ref : (bb, Cb, L)        f32 output
    """
    bb, Cb, L = x_ref.shape
    G = groups
    K = ksize
    bpg = Cb // G
    tpg = w1_ref.shape[0] // G

    w1 = w1_ref[...]                       # (Ct, Cb)  bf16
    w2 = w2_ref[...]                       # (G, K*bpg, tpg) bf16

    for b in range(bb):                    # static unroll (bb is small)
        x = x_ref[b]                       # (Cb, L) f32

        # ---- pointwise 1x1 conv + ReLU: (Ct,Cb) @ (Cb,L) -> (Ct,L), L stays in lanes
        h = jnp.dot(w1, x.astype(jnp.bfloat16),
                    preferred_element_type=jnp.float32)
        h = jnp.maximum(h, 0.0)            # f32 ReLU (v5e has no bf16 VPU)

        # ---- grouped conv, 'same' padding: one stacked-tap matmul per group,
        #      then shift the per-tap results along lanes (roll + edge mask).
        for g in range(G):
            hg = h[g * tpg:(g + 1) * tpg, :].astype(jnp.bfloat16)   # (tpg, L)
            q = jnp.dot(w2[g], hg,
                        preferred_element_type=jnp.float32)          # (K*bpg, L)

            acc = jnp.zeros((bpg, L), dtype=jnp.float32)
            for k in range(K):             # static unroll, K is small
                s = k - pad                # tap offset: out[:, l] needs q_k[:, l + s]
                qk = q[k * bpg:(k + 1) * bpg, :]
                if s != 0:
                    qk = pltpu.roll(qk, (-s) % L, axis=1)            # XLU lane roll
                    lane = jax.lax.broadcasted_iota(jnp.int32, (bpg, L), 1)
                    if s > 0:
                        qk = jnp.where(lane < L - s, qk, 0.0)
                    else:
                        qk = jnp.where(lane >= -s, qk, 0.0)
                acc = acc + qk

            # ---- residual add + outer ReLU, stored lane-dense over L
            rows = slice(g * bpg, (g + 1) * bpg)
            o_ref[b, rows, :] = jnp.maximum(x[rows, :] + acc, 0.0)


def slot_block_forward(x_ncl, w1_torch, w2_torch, groups, *, batch_block=None):
    """x_ncl   : (N, Cb, L) float32, PyTorch NCL layout (kept throughout).
    w1_torch: (Ct, Cb, 1)      nn.Conv1d(basesize, tmpsize, 1, bias=False) weight
    w2_torch: (Cb, Ct//G, K)   nn.Conv1d(tmpsize, basesize, K, 'same', groups=G) weight
    Returns (N, Cb, L) float32.
    """
    N, Cb, L = x_ncl.shape
    Ct = w1_torch.shape[0]
    K = w2_torch.shape[2]
    assert K % 2 == 1, "padding='same' handled for odd kernel sizes"
    assert Cb % groups == 0 and Ct % groups == 0
    pad = (K - 1) // 2
    bpg, tpg = Cb // groups, Ct // groups

    # Batch elements per grid step. Default keeps >=2 grid iterations so both
    # v7x TensorCores get work; raise it for large N to amortize step overhead.
    if batch_block is None:
        batch_block = 1 if N >= 2 else N
    assert N % batch_block == 0

    # --- weight prep (tiny, one-time glue): bf16 operands for the MXU.
    w1_mat = w1_torch[:, :, 0].astype(jnp.bfloat16)                  # (Ct, Cb)
    # Compact per-group weight with taps stacked along M:
    #   w2_stk[g, k*bpg + o, c] = w2_torch[g*bpg + o, c, k]
    w2_stk = (w2_torch.reshape(groups, bpg, tpg, K)
              .transpose(0, 3, 1, 2)                                 # (G, K, bpg, tpg)
              .reshape(groups, K * bpg, tpg)
              .astype(jnp.bfloat16))

    x = x_ncl.astype(jnp.float32)

    kernel = functools.partial(_slot_block_kernel,
                               groups=groups, ksize=K, pad=pad)

    out = pl.pallas_call(
        kernel,
        out_shape=jax.ShapeDtypeStruct((N, Cb, L), jnp.float32),
        grid=(N // batch_block,),
        in_specs=[
            pl.BlockSpec((batch_block, Cb, L), lambda n: (n, 0, 0)),
            pl.BlockSpec((Ct, Cb), lambda n: (0, 0)),
            pl.BlockSpec((groups, K * bpg, tpg), lambda n: (0, 0, 0)),
        ],
        out_specs=pl.BlockSpec((batch_block, Cb, L), lambda n: (n, 0, 0)),
        compiler_params=pltpu.CompilerParams(
            dimension_semantics=("parallel",)),
    )(x, w1_mat, w2_stk)

    return out


def slot_block_reference(x_ncl, w1_torch, w2_torch, groups):
    """Pure-JAX reference following torch Conv1d semantics (NCL, f32)."""
    N, Cb, L = x_ncl.shape
    Ct = w1_torch.shape[0]
    K = w2_torch.shape[2]
    pad = (K - 1) // 2
    tpg, bpg = Ct // groups, Cb // groups

    h = jnp.einsum('ncl,tc->ntl', x_ncl, w1_torch[:, :, 0])
    h = jnp.maximum(h, 0.0)
    hp = jnp.pad(h, ((0, 0), (0, 0), (pad, pad)))

    out = jnp.zeros((N, Cb, L), dtype=jnp.float32)
    for g in range(groups):
        hg = hp[:, g * tpg:(g + 1) * tpg, :]                 # (N, tpg, L+K-1)
        wg = w2_torch[g * bpg:(g + 1) * bpg]                 # (bpg, tpg, K)
        for k in range(K):
            out = out.at[:, g * bpg:(g + 1) * bpg, :].add(
                jnp.einsum('ncl,oc->nol', hg[:, :, k:k + L], wg[:, :, k]))
    return jnp.maximum(x_ncl + out, 0.0)


if __name__ == "__main__":
    key = jax.random.PRNGKey(0)

    # Case 1: shapes matching the module's small config.
    N, basesize, tmpsize, L = 2, 8, 16, 16
    kernel_size, groups = 3, 2
    kx, kw1, kw2, key = *jax.random.split(key, 3), jax.random.split(key, 4)[3]
    x = jax.random.normal(kx, (N, basesize, L), dtype=jnp.float32)
    w1 = 0.1 * jax.random.normal(kw1, (tmpsize, basesize, 1), dtype=jnp.float32)
    w2 = 0.1 * jax.random.normal(
        kw2, (basesize, tmpsize // groups, kernel_size), dtype=jnp.float32)

    fwd = jax.jit(functools.partial(slot_block_forward, groups=groups))
    y = fwd(x, w1, w2)
    jax.block_until_ready(y)
    y_ref = slot_block_reference(x, w1, w2, groups)
    assert y.shape == (N, basesize, L)
    # bf16 MXU operands -> loosened tolerance vs f32 reference.
    assert jnp.allclose(y, y_ref, rtol=1e-2, atol=1e-2), "mismatch vs reference (case 1)"

    # Case 2: slightly larger config (K=5, G=4, longer L) to exercise rolls/masks.
    N2, bs2, ts2, L2, K2, G2 = 4, 16, 32, 128, 5, 4
    k2x, k2w1, k2w2 = jax.random.split(key, 3)
    x2 = jax.random.normal(k2x, (N2, bs2, L2), dtype=jnp.float32)
    w1b = 0.1 * jax.random.normal(k2w1, (ts2, bs2, 1), dtype=jnp.float32)
    w2b = 0.1 * jax.random.normal(k2w2, (bs2, ts2 // G2, K2), dtype=jnp.float32)

    fwd2 = jax.jit(functools.partial(slot_block_forward, groups=G2, batch_block=2))
    y2 = fwd2(x2, w1b, w2b)
    jax.block_until_ready(y2)
    y2_ref = slot_block_reference(x2, w1b, w2b, G2)
    assert y2.shape == (N2, bs2, L2)
    assert jnp.allclose(y2, y2_ref, rtol=1e-2, atol=1e-2), "mismatch vs reference (case 2)"

    print("KERNEL_OK")
</pallas_src>

<mosaic_0001>
module attributes {stable_mosaic.version = 11 : i64} {
  func.func @_slot_block_kernel(%arg0: i32, %arg1: memref<1x8x16xf32, #tpu.memory_space<vmem>>, %arg2: memref<16x8xbf16, #tpu.memory_space<vmem>>, %arg3: memref<2x12x8xbf16, #tpu.memory_space<vmem>>, %arg4: memref<1x8x16xf32, #tpu.memory_space<vmem>>) attributes {dimension_semantics = [#tpu.dimension_semantics<parallel>], iteration_bounds = array<i64: 2>, scalar_prefetch = 0 : i64, scratch_operands = 0 : i64, tpu.core_type = #tpu.core_type<tc>, window_params = [{transform_indices = @transform_0, window_bounds = array<i64: 1, 8, 16>}, {pipeline_mode = #tpu.pipeline_mode<synchronous>, transform_indices = @transform_1, window_bounds = array<i64: 16, 8>}, {pipeline_mode = #tpu.pipeline_mode<synchronous>, transform_indices = @transform_2, window_bounds = array<i64: 2, 12, 8>}, {transform_indices = @transform_3, window_bounds = array<i64: 1, 8, 16>}]} {
    %c0 = arith.constant 0 : index
    %c0_0 = arith.constant 0 : index
    %0 = vector.load %arg2[%c0, %c0_0] : memref<16x8xbf16, #tpu.memory_space<vmem>>, vector<16x8xbf16>
    %c0_1 = arith.constant 0 : index
    %c0_2 = arith.constant 0 : index
    %c0_3 = arith.constant 0 : index
    %1 = vector.load %arg3[%c0_1, %c0_2, %c0_3] : memref<2x12x8xbf16, #tpu.memory_space<vmem>>, vector<2x12x8xbf16>
    %c0_4 = arith.constant 0 : index
    %c0_5 = arith.constant 0 : index
    %c0_6 = arith.constant 0 : index
    %2 = vector.load %arg1[%c0_4, %c0_5, %c0_6] : memref<1x8x16xf32, #tpu.memory_space<vmem>>, vector<1x8x16xf32>
    %3 = vector.shape_cast %2 : vector<1x8x16xf32> to vector<8x16xf32>
    %4 = arith.truncf %3 : vector<8x16xf32> to vector<8x16xbf16>
    %cst = arith.constant dense<0.000000e+00> : vector<16x16xf32>
    %5 = tpu.matmul %0, %4, %cst {dimension_numbers = #tpu.dot_dimension_numbers<[1], [0], [0], [1], [0, 0, 1, 1], [], []>} : vector<16x8xbf16>, vector<8x16xbf16>, vector<16x16xf32> -> vector<16x16xf32>
    %cst_7 = arith.constant 0.000000e+00 : f32
    %6 = vector.broadcast %cst_7 : f32 to vector<16x16xf32>
    %7 = arith.maximumf %5, %6 : vector<16x16xf32>
    %8 = vector.extract_strided_slice %7 {offsets = [0, 0], sizes = [8, 16], strides = [1, 1]} : vector<16x16xf32> to vector<8x16xf32>
    %9 = arith.truncf %8 : vector<8x16xf32> to vector<8x16xbf16>
    %10 = vector.extract_strided_slice %1 {offsets = [0, 0, 0], sizes = [1, 12, 8], strides = [1, 1, 1]} : vector<2x12x8xbf16> to vector<1x12x8xbf16>
    %11 = vector.shape_cast %10 : vector<1x12x8xbf16> to vector<12x8xbf16>
    %cst_8 = arith.constant dense<0.000000e+00> : vector<12x16xf32>
    %12 = tpu.matmul %11, %9, %cst_8 {dimension_numbers = #tpu.dot_dimension_numbers<[1], [0], [0], [1], [0, 0, 1, 1], [], []>} : vector<12x8xbf16>, vector<8x16xbf16>, vector<12x16xf32> -> vector<12x16xf32>
    %cst_9 = arith.constant 0.000000e+00 : f32
    %13 = vector.broadcast %cst_9 : f32 to vector<4x16xf32>
    %14 = vector.extract_strided_slice %12 {offsets = [0, 0], sizes = [4, 16], strides = [1, 1]} : vector<12x16xf32> to vector<4x16xf32>
    %c1_i32 = arith.constant 1 : i32
    %15 = tpu.dynamic_rotate %14 by %c1_i32 dim 1 : vector<4x16xf32>, i32 -> vector<4x16xf32>
    %16 = tpu.iota {dimensions = array<i32: 1>} : vector<4x16xi32>
    %c1_i32_10 = arith.constant 1 : i32
    %17 = vector.broadcast %c1_i32_10 : i32 to vector<4x16xi32>
    %18 = arith.cmpi sge, %16, %17 : vector<4x16xi32>
    %cst_11 = arith.constant 0.000000e+00 : f32
    %19 = vector.broadcast %cst_11 : f32 to vector<4x16xf32>
    %20 = arith.select %18, %15, %19 : vector<4x16xi1>, vector<4x16xf32>
    %21 = arith.addf %13, %20 : vector<4x16xf32>
    %22 = vector.extract_strided_slice %12 {offsets = [4, 0], sizes = [4, 16], strides = [1, 1]} : vector<12x16xf32> to vector<4x16xf32>
    %23 = arith.addf %21, %22 : vector<4x16xf32>
    %24 = vector.extract_strided_slice %12 {offsets = [8, 0], sizes = [4, 16], strides = [1, 1]} : vector<12x16xf32> to vector<4x16xf32>
    %c15_i32 = arith.constant 15 : i32
    %25 = tpu.dynamic_rotate %24 by %c15_i32 dim 1 : vector<4x16xf32>, i32 -> vector<4x16xf32>
    %26 = tpu.iota {dimensions = array<i32: 1>} : vector<4x16xi32>
    %c15_i32_12 = arith.constant 15 : i32
    %27 = vector.broadcast %c15_i32_12 : i32 to vector<4x16xi32>
    %28 = arith.cmpi slt, %26, %27 : vector<4x16xi32>
    %cst_13 = arith.constant 0.000000e+00 : f32
    %29 = vector.broadcast %cst_13 : f32 to vector<4x16xf32>
    %30 = arith.select %28, %25, %29 : vector<4x16xi1>, vector<4x16xf32>
    %31 = arith.addf %23, %30 : vector<4x16xf32>
    %32 = vector.extract_strided_slice %3 {offsets = [0, 0], sizes = [4, 16], strides = [1, 1]} : vector<8x16xf32> to vector<4x16xf32>
    %33 = arith.addf %32, %31 : vector<4x16xf32>
    %cst_14 = arith.constant 0.000000e+00 : f32
    %34 = vector.broadcast %cst_14 : f32 to vector<4x16xf32>
    %35 = arith.maximumf %33, %34 : vector<4x16xf32>
    %c0_15 = arith.constant 0 : index
    %c0_16 = arith.constant 0 : index
    %c0_17 = arith.constant 0 : index
    %36 = vector.load %arg4[%c0_15, %c0_16, %c0_17] : memref<1x8x16xf32, #tpu.memory_space<vmem>>, vector<1x4x16xf32>
    %37 = vector.shape_cast %36 : vector<1x4x16xf32> to vector<4x16xf32>
    %38 = vector.shape_cast %35 : vector<4x16xf32> to vector<1x4x16xf32>
    tpu.vector_store %arg4[%c0_15, %c0_16, %c0_17], %38 {strides = array<i32>} : memref<1x8x16xf32, #tpu.memory_space<vmem>>, vector<1x4x16xf32>,
    %39 = vector.extract_strided_slice %7 {offsets = [8, 0], sizes = [8, 16], strides = [1, 1]} : vector<16x16xf32> to vector<8x16xf32>
    %40 = arith.truncf %39 : vector<8x16xf32> to vector<8x16xbf16>
    %41 = vector.extract_strided_slice %1 {offsets = [1, 0, 0], sizes = [1, 12, 8], strides = [1, 1, 1]} : vector<2x12x8xbf16> to vector<1x12x8xbf16>
    %42 = vector.shape_cast %41 : vector<1x12x8xbf16> to vector<12x8xbf16>
    %cst_18 = arith.constant dense<0.000000e+00> : vector<12x16xf32>
    %43 = tpu.matmul %42, %40, %cst_18 {dimension_numbers = #tpu.dot_dimension_numbers<[1], [0], [0], [1], [0, 0, 1, 1], [], []>} : vector<12x8xbf16>, vector<8x16xbf16>, vector<12x16xf32> -> vector<12x16xf32>
    %cst_19 = arith.constant 0.000000e+00 : f32
    %44 = vector.broadcast %cst_19 : f32 to vector<4x16xf32>
    %45 = vector.extract_strided_slice %43 {offsets = [0, 0], sizes = [4, 16], strides = [1, 1]} : vector<12x16xf32> to vector<4x16xf32>
    %c1_i32_20 = arith.constant 1 : i32
    %46 = tpu.dynamic_rotate %45 by %c1_i32_20 dim 1 : vector<4x16xf32>, i32 -> vector<4x16xf32>
    %47 = tpu.iota {dimensions = array<i32: 1>} : vector<4x16xi32>
    %c1_i32_21 = arith.constant 1 : i32
    %48 = vector.broadcast %c1_i32_21 : i32 to vector<4x16xi32>
    %49 = arith.cmpi sge, %47, %48 : vector<4x16xi32>
    %cst_22 = arith.constant 0.000000e+00 : f32
    %50 = vector.broadcast %cst_22 : f32 to vector<4x16xf32>
    %51 = arith.select %49, %46, %50 : vector<4x16xi1>, vector<4x16xf32>
    %52 = arith.addf %44, %51 : vector<4x16xf32>
    %53 = vector.extract_strided_slice %43 {offsets = [4, 0], sizes = [4, 16], strides = [1, 1]} : vector<12x16xf32> to vector<4x16xf32>
    %54 = arith.addf %52, %53 : vector<4x16xf32>
    %55 = vector.extract_strided_slice %43 {offsets = [8, 0], sizes = [4, 16], strides = [1, 1]} : vector<12x16xf32> to vector<4x16xf32>
    %c15_i32_23 = arith.constant 15 : i32
    %56 = tpu.dynamic_rotate %55 by %c15_i32_23 dim 1 : vector<4x16xf32>, i32 -> vector<4x16xf32>
    %57 = tpu.iota {dimensions = array<i32: 1>} : vector<4x16xi32>
    %c15_i32_24 = arith.constant 15 : i32
    %58 = vector.broadcast %c15_i32_24 : i32 to vector<4x16xi32>
    %59 = arith.cmpi slt, %57, %58 : vector<4x16xi32>
    %cst_25 = arith.constant 0.000000e+00 : f32
    %60 = vector.broadcast %cst_25 : f32 to vector<4x16xf32>
    %61 = arith.select %59, %56, %60 : vector<4x16xi1>, vector<4x16xf32>
    %62 = arith.addf %54, %61 : vector<4x16xf32>
    %63 = vector.extract_strided_slice %3 {offsets = [4, 0], sizes = [4, 16], strides = [1, 1]} : vector<8x16xf32> to vector<4x16xf32>
    %64 = arith.addf %63, %62 : vector<4x16xf32>
    %cst_26 = arith.constant 0.000000e+00 : f32
    %65 = vector.broadcast %cst_26 : f32 to vector<4x16xf32>
    %66 = arith.maximumf %64, %65 : vector<4x16xf32>
    %c0_27 = arith.constant 0 : index
    %c4 = arith.constant 4 : index
    %c0_28 = arith.constant 0 : index
    %67 = vector.load %arg4[%c0_27, %c4, %c0_28] : memref<1x8x16xf32, #tpu.memory_space<vmem>>, vector<1x4x16xf32>
    %68 = vector.shape_cast %67 : vector<1x4x16xf32> to vector<4x16xf32>
    %69 = vector.shape_cast %66 : vector<4x16xf32> to vector<1x4x16xf32>
    tpu.vector_store %arg4[%c0_27, %c4, %c0_28], %69 {strides = array<i32>} : memref<1x8x16xf32, #tpu.memory_space<vmem>>, vector<1x4x16xf32>,
    return
  }
  func.func @transform_0(%arg0: i32) -> (i32, i32, i32) {
    %c0_i32 = arith.constant 0 : i32
    %c0_i32_0 = arith.constant 0 : i32
    %c0_i32_1 = arith.constant 0 : i32
    return %arg0, %c0_i32, %c0_i32_0 : i32, i32, i32
  }
  func.func @transform_1(%arg0: i32) -> (i32, i32) {
    %c0_i32 = arith.constant 0 : i32
    %c0_i32_0 = arith.constant 0 : i32
    %c0_i32_1 = arith.constant 0 : i32
    return %c0_i32, %c0_i32_0 : i32, i32
  }
  func.func @transform_2(%arg0: i32) -> (i32, i32, i32) {
    %c0_i32 = arith.constant 0 : i32
    %c0_i32_0 = arith.constant 0 : i32
    %c0_i32_1 = arith.constant 0 : i32
    %c0_i32_2 = arith.constant 0 : i32
    return %c0_i32, %c0_i32_0, %c0_i32_1 : i32, i32, i32
  }
  func.func @transform_3(%arg0: i32) -> (i32, i32, i32) {
    %c0_i32 = arith.constant 0 : i32
    %c0_i32_0 = arith.constant 0 : i32
    %c0_i32_1 = arith.constant 0 : i32
    return %arg0, %c0_i32, %c0_i32_0 : i32, i32, i32
  }
}

</mosaic_0001>

<bundles_post_ra>
// kernel: slot_block_forward.1
= control target key start
LH: loop header
LB: loop body
LE: loop exit
PB: predicated region body
PF: predicated region fallthrough
CT: control target
= control target key end

     0   :  { %8 = vsyncpa [#allocation3], 0  ;;  %s776_s0 = inlined_call_operand.vmem [shape: f32[2,8,16], index: 0, kind: input, shape index: {}]   ;;  %s777_s1 = inlined_call_operand.vmem [shape: bf16[16,8], index: 1, kind: input, shape index: {}]   ;;  %s778_s2 = inlined_call_operand.vmem [shape: bf16[2,12,8], index: 2, kind: input, shape index: {}]   ;;  %s779_s3 = inlined_call_operand.hbm [shape: f32[2,8,16], index: 3, kind: output, shape index: {}]  }
   0x1   :  { %10 = vsyncpa [#allocation3 + $0x1], 0  ;;  %s657_s12 = smov 0   ;;  %s659_s13 = smov 0  }
   0x2   :  { %s661_s14 = smov 0   ;;  %s663_s15 = smov 0  }
   0x3 LB: > { %s678_s16 = sadd.s32 4294967295, %s629_s15   ;;  %s482_s17 = sadd.s32 4294967294, %s629_s15   ;;  %s629_s15 = sphi %s663_s15, %s785_s15   ;;  %s625_s14 = sphi %s661_s14, %s784_s14   ;;  %s621_s13 = sphi %s659_s13, %s783_s13   ;;  %s617_s12 = sphi %s657_s12, %s782_s12  }
   0x4   : > { %s682_s18 = sadd.s32 1, %s629_s15   ;;  %s91_s19 = sadd.s32 1, %s625_s14 }
   0x5   : > { %s88_s20 = ssub.s32 %s629_s15, %s682_s18  ;;  %p101_p0 = scmp.ne.s32.totalorder %s625_s14, %s621_s13 }
   0x6   : > { %p89_p1 = scmp.eq.s32.totalorder %s88_s20, 0  ;;  %p102_p2 = scmp.eq.s32.totalorder %s678_s16, 1 }
   0x7   : > { %p107_p3 = scmp.ne.s32.totalorder %s621_s13, %s617_s12  ;;  %p108_p4 = scmp.eq.s32.totalorder %s482_s17, 1 }
   0x8   : > { %s693_s21 = scalar_select %p89_p1, %s625_s14, %s91_s19  }
   0x9   : > { %p695_p5 = por %p102_p2, %p101_p0  ;;  %p699_p6 = por %p108_p4, %p107_p3 }
   0xa   : > { %p485_p7 = scmp.ge.s32.totalorder %s629_s15, 1  ;;  %p139_p8 = scmp.lt.s32.totalorder %s629_s15, 3 }
   0xc   : > { %p140_p9 = pnand %p485_p7, %p139_p8 }
   0xd   : > { %p162_p10 = scmp.lt.s32.totalorder (!%p140_p9), %s678_s16, 1  ;;  %s633_s8 = smov (!%p140_p9), 16  }
   0xe   : > { %143 = sbr.rel (%p140_p9) target bundleno = 803 (0x323), region = 32  ;;  %s634_s9 = smov (!%p140_p9), 113  }
   0xf   : > { %s635_s10 = smov (!%p140_p9), 127   ;;  %s159_s11 = sand.u32 (!%p140_p9), 1, %s621_s13  }
  0x10   : > { %s486_s17 = sshll.u32 (!%p140_p9), %s159_s11, 3  ;;  %s495_s19 = sshll.u32 (!%p140_p9), %s678_s16, 7 }
  0x11   : > { %s161_s20 = scalar_lea.vmem (!%p140_p9), [#allocation2], %s486_s17  ;;  %s421_s27 = scalar_lea.hbm (!%p140_p9), %s779_s3, %s495_s19 }
  0x13   : > { %v631_v0 = vmov 0.0   ;;  %vm632_vm0 = vmmov 0   ;;  %s163_s24 = scalar_select %p162_p10, %s678_s16, 1  ;;  %vm184_vm1 = vcmask 1043456   ;;  %v566_v4 = vld [vmem:[%s777_s1] sm:$0xff]   ;;  %vm180_vm2 = vcmask 64512  }
  0x14   : > { %504 = vmatprep.subr.bf16.mxu0 %v631_v0  ;;  %506 = vmatprep.mubr.msk.bf16.mxu0 %vm632_vm0, %v631_v0  ;;  %v568_v12 = vld [vmem:[%s778_s2] sm:$0x3f]   ;;  %v567_v16 = vld [vmem:[%s778_s2 + $0x8] sm:$0x3f]   ;;  %vm284_vm3 = vcmask 1047680   ;;  %v291_v41 = vlaneseq  ;;  %vm407_vm6 = vcmask 130052  }
  0x15   : > { %510 = vmatprep.subr.bf16.mxu1 %v631_v0  ;;  %512 = vmatprep.mubr.msk.bf16.mxu1 %vm632_vm0, %v631_v0  ;;  %s487_s25 = sshll.u32 %s163_s24, 3  ;;  %s423_s24 = sshll.u32 %s161_s20, 4  ;;  %vm319_vm7 = vcmask 125952   ;;  %s424_s24 = int_to_ptr.vmem [resolvable:$true] %s423_s24 }
  0x16   : > { %s165_s28 = scalar_lea.vmem %s776_s0, %s487_s25  ;;  %v292_v42 = vand.u32 127, %v291_v41  ;;  %s569_s29 = scalar_lea.vmem %s424_s24, 128 }
  0x17   : > { %v712_v1 = vld [vmem:[%s165_s28] sm:$0xff]  ;;  %s410_s28 = scalar_lea.sflag [#allocation3], %s159_s11  ;;  %p570_p11 = scmp.ne.s32.totalorder %s424_s24, %s569_s29 }
  0x18   : > { %v174_v2 = vpack.c.bf16 %v712_v1, %v712_v1  ;;  %vm293_vm4 = vcmp.ge.s32.totalorder %v292_v42, 1  ;;  %vm310_vm5 = vcmp.lt.s32.totalorder %v292_v42, 15  ;;  %s636_s16 = smov [#allocation2]  }
  0x19   : > { %p571_p12 = pnand %p570_p11, %p695_p5  ;;  %s573_s30 = sshll.u32 %s636_s16, 4  ;;  %s574_s30 = int_to_ptr.vmem [resolvable:$false] %s573_s30 }
  0x1a   : > { %v186_v3 = vsel %vm184_vm1, %v174_v2, 0  ;;  %s575_s4 = scalar_lea.vmem %s574_s30, 256  ;;  %p576_p0 = scmp.lt.s32.totalorder %s424_s24, %s574_s30 }
  0x1b   : > { %505 = vmatpush3.bf16.msra.mxu0 %v186_v3  ;;  %p572_p13 = pneg %p571_p12  ;;  %p577_p1 = scmp.lt.s32.totalorder %s575_s4, %s569_s29 }
  0x1c   : > { %516 = vmatprep.subr.bf16.mxu0 %v631_v0 }
  0x1d   : > { %p578_p2 = por %p577_p1, %p576_p0 }
  0x1e   : > { %507 = vmatmul.mubr.msk.bf16.vlgmr.msra.gmra.mxu0 %vm180_vm2, %v566_v4 }
  0x1f   : > { %518 = vmatprep.mubr.msk.bf16.mxu0 %vm632_vm0, %v631_v0  ;;  %p579_p3 = pnand %p578_p2, %p572_p13 }
  0xde   : > { %v222_v5 = vpop.f32.mrf.mxu0 }
  0xdf   : > { %v229_v6 = vmax.f32 %v222_v5, 0.0 }
  0xe0   : > { %v508_v7 = vpop.f32.mrf.mxu0 }
  0xe1   : > { %v231_v8 = vpack.c.bf16 %v229_v6, %v229_v6 }
  0xe2   : > { %v225_v9 = vpop.f32.mrf.mxu0 }
  0xe3   : > { %v230_v10 = vmax.f32 %v225_v9, 0.0  ;;  %v241_v11 = vsel %vm184_vm1, %v231_v8, 0 }
  0xe4   : > { %v509_v13 = vpop.f32.mrf.mxu0  ;;  %511 = vmatpush3.bf16.msra.mxu1 %v241_v11 }
  0xe5   : > { %v321_v14 = vpack.c.bf16 %v230_v10, %v230_v10 }
  0xe7   : > { %v331_v15 = vsel %vm184_vm1, %v321_v14, 0  ;;  %513 = vmatmul.mubr.msk.bf16.vlgmr.msra.gmra.mxu1 %vm180_vm2, %v568_v12 }
  0xe8   : > { %517 = vmatpush3.bf16.msra.mxu0 %v331_v15 }
  0xeb   : > { %519 = vmatmul.mubr.msk.bf16.vlgmr.msra.gmra.mxu0 %vm180_vm2, %v567_v16 }
 0x1a7   : > { %v277_v17 = vpop.f32.mrf.mxu1 }
 0x1a8   : > { %v301_v52 = vrot.slane %v277_v17, 4 }
 0x1a9   : > { %v514_v18 = vpop.f32.mrf.mxu1 }
 0x1ab   : > { %v367_v19 = vpop.f32.mrf.mxu0  ;;  %v280_v20 = vpop.f32.mrf.mxu1 }
 0x1ac   : > { %374 = vrot.lane.b32.xlu0 %v367_v19, %s633_s8  ;;  %v387_v45 = vrot.slane %v367_v19, 4 }
 0x1ad   : > { %v520_v21 = vpop.f32.mrf.mxu0  ;;  %v515_v22 = vpop.f32.mrf.mxu1 }
 0x1af   : > { %v370_v23 = vpop.f32.mrf.mxu0 }
 0x1b0   : > { %285 = vrot.lane.b32.xlu0 %v277_v17, %s633_s8  ;;  %390 = vrot.lane.b32.xlu1 %v370_v23, %s633_s8 }
 0x1b1   : > { %v521_v24 = vpop.f32.mrf.mxu0 }
 0x1b4   : > { %304 = vrot.lane.b32.xlu1 %v280_v20, %s633_s8 }
 0x21e   : > { %v375_v25 = vpop.permute.xlu0 %374 }
 0x21f   : > { %v376_v26 = vsel %vm284_vm3, %v375_v25, %v367_v19 }
 0x220   : > { %377 = vrot.lane.b32.xlu0 %v376_v26, %s633_s8 }
 0x222   : > { %v286_v27 = vpop.permute.xlu0 %285  ;;  %v391_v28 = vpop.permute.xlu1 %390 }
 0x223   : > { %v287_v29 = vsel %vm284_vm3, %v286_v27, %v277_v17  ;;  %v392_v30 = vsel %vm284_vm3, %v391_v28, %v370_v23 }
 0x224   : > { %288 = vrot.lane.b32.xlu1 %v287_v29, %s633_s8  ;;  %393 = vrot.lane.b32.xlu0 %v392_v30, %s633_s8 }
 0x226   : > { %v305_v31 = vpop.permute.xlu1 %304 }
 0x227   : > { %v306_v32 = vsel %vm284_vm3, %v305_v31, %v280_v20 }
 0x228   : > { %307 = vrot.lane.b32.xlu1 %v306_v32, %s633_s8 }
 0x292   : > { %v378_v33 = vpop.permute.xlu0 %377 }
 0x293   : > { %v379_v34 = vsel %vm284_vm3, %v378_v33, %v367_v19 }
 0x294   : > { %381 = vrot.lane.b32.xlu0 %v379_v34, %s634_s9 }
 0x296   : > { %v394_v35 = vpop.permute.xlu0 %393  ;;  %v289_v36 = vpop.permute.xlu1 %288 }
 0x297   : > { %v395_v37 = vsel %vm284_vm3, %v394_v35, %v370_v23  ;;  %v290_v38 = vsel %vm284_vm3, %v289_v36, %v277_v17 }
 0x298   : > { %397 = vrot.lane.b32.xlu0 %v395_v37, %s635_s10  ;;  %295 = vrot.lane.b32.xlu1 %v290_v38, %s634_s9 }
 0x29a   : > { %v308_v39 = vpop.permute.xlu1 %307 }
 0x29b   : > { %v309_v40 = vsel %vm284_vm3, %v308_v39, %v280_v20 }
 0x29c   : > { %312 = vrot.lane.b32.xlu1 %v309_v40, %s635_s10 }
 0x306   : > { %v382_v43 = vpop.permute.xlu0 %381 }
 0x307   : > { %v384_v44 = vsel %vm293_vm4, %v382_v43, 0.0 }
 0x308   : > { %v389_v46 = vadd.f32 %v387_v45, %v384_v44 }
 0x30a   : > { %v398_v47 = vpop.permute.xlu0 %397  ;;  %v296_v48 = vpop.permute.xlu1 %295 }
 0x30b   : > { %v400_v49 = vsel %vm310_vm5, %v398_v47, 0.0  ;;  %v298_v50 = vsel %vm293_vm4, %v296_v48, 0.0 }
 0x30c   : > { %v401_v51 = vadd.f32 %v400_v49, %v389_v46  ;;  %v303_v54 = vadd.f32 %v301_v52, %v298_v50 }
 0x30e   : > { %v403_v53 = vrot.slane %v401_v51, 4  ;;  %v313_v55 = vpop.permute.xlu1 %312 }
 0x30f   : > { %v315_v56 = vsel %vm310_vm5, %v313_v55, 0.0 }
 0x310   : > { %v405_v57 = vadd.f32 %v403_v53, %v712_v1  ;;  %v316_v58 = vadd.f32 %v315_v56, %v303_v54 }
 0x312   : > { %v406_v59 = vmax.f32 %v405_v57, 0.0  ;;  %v317_v60 = vadd.f32 %v316_v58, %v712_v1 }
 0x314   : > { %v318_v61 = vmax.f32 %v317_v60, 0.0  ;;  %408 = vst.msk [vmem:[%s161_s20] sm:$0xf0] %vm407_vm6, %v406_v59 }
 0x316   : > { %320 = vst.msk [vmem:[%s161_s20] sm:$0xf] %vm319_vm7, %v318_v61 }
 0x317   : > { %582 = shalt.err (!%p579_p3)
}
 0x318   : > { %s583_s5 = scalar_lea.hbm %s421_s27, 128  ;;  %s587_s8 = scalar_lea.hbm %s779_s3, 256 }
 0x319   : > { %p584_p4 = scmp.ne.s32.totalorder %s421_s27, %s583_s5  ;;  %p588_p9 = scmp.lt.s32.totalorder %s421_s27, %s779_s3 }
 0x31a   : > { %p589_p10 = scmp.lt.s32.totalorder %s587_s8, %s583_s5 }
 0x31b   : > { %p585_p7 = pnand %p584_p4, %p695_p5 }
 0x31c   : > { %p590_p11 = por %p589_p10, %p588_p9 }
 0x31d   : > { %p586_p8 = pneg %p585_p7 }
 0x31f   : > { %p591_p12 = pnand %p590_p11, %p586_p8 }
 0x321   : > { %594 = shalt.err (!%p591_p12)
}
 0x322   : > { %522 = dma.vmem_to_hbm [thread:$0]  (%p695_p5), %s424_s24, 128, %s421_s27, %s410_s28  }
 0x323 PF: > { %p528_p13 = scmp.ge.s32.totalorder %s629_s15, 2  ;;  %s435_s11 = sand.u32 1, %s617_s12  }
 0x324   : > { %s436_s17 = scalar_lea.sflag [#allocation3], %s435_s11 }
 0x325   : > { %p525_p0 = pnand %p528_p13, %p699_p6 }
 0x327   : > { %p526_p1 = pneg %p525_p0 }
 0x329   : > { %612 = dma.done.wait (%p526_p1), %s436_s17, 128  }
 0x32a   : > { %614 = vsyncadd (%p526_p1), %s436_s17, 4294967168  ;;  %p13_p2 = scmp.ge.s32.totalorder %s682_s18, 4   ;;  %s782_s12 = smov %s621_s13 }
 0x32b   : > { %s783_s13 = smov %s625_s14  ;;  %s784_s14 = smov %s693_s21 }
 0x32c   : > { %s785_s15 = smov %s682_s18  ;;  %15 = sbr.rel (!%p13_p2) target bundleno = 3 (0x3), region = 67 }
 0x331   :  { %441 = vsyncpa [#allocation3], 1 }
 0x332   :  { %443 = vsyncpa [#allocation3 + $0x1], 1 }

</bundles_post_ra>
